<compile_context>
chip_gen: v6e
topology: v6e:2x2x1
jax: 0.10.0
libtpu: 0.0.40
codegen_flags: <defaults>
</compile_context>

<pallas_src>
import functools

import numpy as np
import jax
import jax.numpy as jnp
from jax.experimental import pallas as pl
from jax.experimental.pallas import tpu as pltpu


def _emb_kernel(dist_ref, offset_ref, out_ref, *, coeff):
    # dist_ref  : (TN, 1)  distances for this tile (input dtype)
    # offset_ref: (1, G)   Gaussian centers (f32)
    # out_ref   : (TN, G)  output tile (promoted dtype)
    d = dist_ref[...].astype(jnp.float32)              # (TN, 1)
    off = offset_ref[...]                               # (1, G)
    t = d - off                                          # broadcast -> (TN, G), f32
    out_ref[...] = jnp.exp(coeff * (t * t)).astype(out_ref.dtype)


def emb_forward(dist, *, start=0.0, stop=5.0, num_gaussians=50, tile_n=8192):
    """Gaussian smearing of distances.

    dist: any shape; returns (N, num_gaussians) with N = dist.size.
    dtype follows torch promotion against the f32 offset buffer.
    """
    # "__init__" of the torch module: offset buffer + coeff from offset spacing.
    offset_np = np.linspace(start, stop, num_gaussians, dtype=np.float32)   # (G,)
    step = float(offset_np[1] - offset_np[0])
    coeff = -0.5 / (step ** 2)

    g = int(num_gaussians)
    out_dtype = jnp.promote_types(dist.dtype, jnp.float32)

    flat = dist.reshape(-1)
    n = int(flat.shape[0])

    # Tile over N.  Block second-minor dim must be a multiple of 8 (or the full
    # dim); partial edge blocks (n % tn != 0) are handled by Pallas, so no
    # explicit padding / slicing is needed.
    n8 = ((n + 7) // 8) * 8
    tn = min(int(tile_n), n8)
    tn = max(8, (tn // 8) * 8)
    num_tiles = pl.cdiv(n, tn)

    dist_col = flat.reshape(n, 1)                              # (N, 1)
    offset_row = jnp.asarray(offset_np).reshape(1, g)          # (1, G) f32

    kernel = functools.partial(_emb_kernel, coeff=coeff)

    out = pl.pallas_call(
        kernel,
        out_shape=jax.ShapeDtypeStruct((n, g), out_dtype),
        grid_spec=pl.GridSpec(
            grid=(num_tiles,),
            in_specs=[
                pl.BlockSpec((tn, 1), lambda i: (i, 0)),   # distances for tile i
                pl.BlockSpec((1, g), lambda i: (0, 0)),    # offsets (resident, no re-DMA)
            ],
            out_specs=pl.BlockSpec((tn, g), lambda i: (i, 0)),
        ),
        compiler_params=pltpu.CompilerParams(
            dimension_semantics=("parallel",),       # shard tiles across TCs on v7x
            vmem_limit_bytes=40 * 1024 * 1024,       # headroom for 8192-row tiles on v5e
        ),
    )(dist_col, offset_row)
    return out


def emb_reference(dist, *, start=0.0, stop=5.0, num_gaussians=50):
    offset = jnp.asarray(np.linspace(start, stop, num_gaussians, dtype=np.float32))
    step = float(offset[1] - offset[0])
    coeff = -0.5 / (step ** 2)
    d = dist.reshape(-1, 1).astype(jnp.float32) - offset.reshape(1, -1)
    return jnp.exp(coeff * d * d)


if __name__ == "__main__":
    key = jax.random.PRNGKey(0)

    # 1) Small vector of distances (single exact tile).
    n = 64
    dist = jax.random.uniform(key, (n,), dtype=jnp.float32, minval=0.0, maxval=5.0)
    out = jax.block_until_ready(emb_forward(dist))
    ref = emb_reference(dist)
    assert out.shape == (n, 50)
    assert jnp.allclose(out, ref, atol=1e-5, rtol=1e-5)

    # 2) Non-divisible N with multiple tiles + partial edge block.
    n2 = 300
    dist2 = jax.random.uniform(jax.random.PRNGKey(1), (n2,), dtype=jnp.float32,
                               minval=0.0, maxval=5.0)
    out2 = jax.block_until_ready(emb_forward(dist2, tile_n=128))
    ref2 = emb_reference(dist2)
    assert out2.shape == (n2, 50)
    assert jnp.allclose(out2, ref2, atol=1e-5, rtol=1e-5)

    # 3) Larger N with default tiling (full tile + partial tail tile).
    n3 = 10000
    dist3 = jax.random.uniform(jax.random.PRNGKey(2), (n3,), dtype=jnp.float32,
                               minval=0.0, maxval=5.0)
    out3 = jax.block_until_ready(emb_forward(dist3))
    ref3 = emb_reference(dist3)
    assert out3.shape == (n3, 50)
    assert jnp.allclose(out3, ref3, atol=1e-5, rtol=1e-5)

    # 4) bf16 input -> promotes to f32 output (matches torch promotion vs f32 buffer).
    dist4 = dist.astype(jnp.bfloat16)
    out4 = jax.block_until_ready(emb_forward(dist4))
    assert out4.dtype == jnp.float32
    ref4 = emb_reference(dist4.astype(jnp.float32))
    assert jnp.allclose(out4, ref4, atol=1e-5, rtol=1e-5)

    print("KERNEL_OK")
</pallas_src>

<mosaic_0001>
module attributes {stable_mosaic.version = 11 : i64} {
  func.func @_emb_kernel(%arg0: i32, %arg1: memref<64x1xf32, #tpu.memory_space<vmem>>, %arg2: memref<1x50xf32, #tpu.memory_space<vmem>>, %arg3: memref<64x50xf32, #tpu.memory_space<vmem>>) attributes {dimension_semantics = [#tpu.dimension_semantics<parallel>], iteration_bounds = array<i64: 1>, scalar_prefetch = 0 : i64, scratch_operands = 0 : i64, tpu.core_type = #tpu.core_type<tc>, window_params = [{transform_indices = @transform_0, window_bounds = array<i64: 64, 1>}, {pipeline_mode = #tpu.pipeline_mode<synchronous>, transform_indices = @transform_1, window_bounds = array<i64: 1, 50>}, {transform_indices = @transform_2, window_bounds = array<i64: 64, 50>}]} {
    %c0 = arith.constant 0 : index
    %c0_0 = arith.constant 0 : index
    %0 = vector.load %arg1[%c0, %c0_0] : memref<64x1xf32, #tpu.memory_space<vmem>>, vector<64x1xf32>
    %c0_1 = arith.constant 0 : index
    %c0_2 = arith.constant 0 : index
    %1 = vector.load %arg2[%c0_1, %c0_2] : memref<1x50xf32, #tpu.memory_space<vmem>>, vector<1x50xf32>
    %2 = vector.broadcast %0 : vector<64x1xf32> to vector<64x50xf32>
    %3 = vector.broadcast %1 : vector<1x50xf32> to vector<64x50xf32>
    %4 = arith.subf %2, %3 : vector<64x50xf32>
    %5 = arith.mulf %4, %4 : vector<64x50xf32>
    %cst = arith.constant -48.0199966 : f32
    %6 = vector.broadcast %cst : f32 to vector<64x50xf32>
    %7 = arith.mulf %6, %5 : vector<64x50xf32>
    %8 = math.exp %7 : vector<64x50xf32>
    %c0_3 = arith.constant 0 : index
    %c0_4 = arith.constant 0 : index
    %9 = vector.load %arg3[%c0_3, %c0_4] : memref<64x50xf32, #tpu.memory_space<vmem>>, vector<64x50xf32>
    tpu.vector_store %arg3[%c0_3, %c0_4], %8 {strides = array<i32>} : memref<64x50xf32, #tpu.memory_space<vmem>>, vector<64x50xf32>,
    return
  }
  func.func @transform_0(%arg0: i32) -> (i32, i32) {
    %c0_i32 = arith.constant 0 : i32
    %c0_i32_0 = arith.constant 0 : i32
    return %arg0, %c0_i32 : i32, i32
  }
  func.func @transform_1(%arg0: i32) -> (i32, i32) {
    %c0_i32 = arith.constant 0 : i32
    %c0_i32_0 = arith.constant 0 : i32
    %c0_i32_1 = arith.constant 0 : i32
    return %c0_i32, %c0_i32_0 : i32, i32
  }
  func.func @transform_2(%arg0: i32) -> (i32, i32) {
    %c0_i32 = arith.constant 0 : i32
    %c0_i32_0 = arith.constant 0 : i32
    return %arg0, %c0_i32 : i32, i32
  }
}

</mosaic_0001>

<bundles_post_ra>
// kernel: tpu_custom_call.1
= control target key start
LH: loop header
LB: loop body
LE: loop exit
PB: predicated region body
PF: predicated region fallthrough
CT: control target
= control target key end

     0   :  { %v139_v0 = vmov 0   ;;  %vm106_vm0 = vcmask 408576   ;;  %s214_s0 = inlined_call_operand.vmem [shape: f32[64,1], index: 0, kind: input, shape index: {}]   ;;  %s215_s1 = inlined_call_operand.vmem [shape: f32[1,50], index: 1, kind: input, shape index: {}]   ;;  %s216_s2 = inlined_call_operand.vmem [shape: f32[64,50], index: 2, kind: output, shape index: {}]  }
   0x1   :  { %122 = vset.pattern.permute.xlu1 %v139_v0  ;;  %121 = vset.pattern.permute.xlu0 %v139_v0  ;;  %v13_v1 = vld [vmem:[%s214_s0 + $0x10] sm:$0xff]  ;;  %v11_v2 = vld [vmem:[%s214_s0] sm:$0xff]  ;;  %v14_v3 = vld [vmem:[%s214_s0 + $0x18] sm:$0xff] }
   0x2   :  { %32 = vperm.xlu1 %122, %v13_v1   ;;  %22 = vperm.xlu0 %121, %v11_v2   ;;  %v12_v4 = vld [vmem:[%s214_s0 + $0x8] sm:$0xff]  ;;  %v15_v6 = vld [vmem:[%s214_s0 + $0x20] sm:$0xff]  ;;  %v18_v7 = vld [vmem:[%s214_s0 + $0x38] sm:$0xff] }
   0x3   :  { %v16_v5 = vld [vmem:[%s214_s0 + $0x28] sm:$0xff]  ;;  %v17_v8 = vld [vmem:[%s214_s0 + $0x30] sm:$0xff]  ;;  %v119_v9 = vld [vmem:[%s215_s1] ss:$0 sm:$0xff] }
   0x6   :  { %37 = vperm.xlu1 %122, %v14_v3   ;;  %27 = vperm.xlu0 %121, %v12_v4  }
   0xa   :  { %47 = vperm.xlu1 %122, %v16_v5   ;;  %42 = vperm.xlu0 %121, %v15_v6  }
   0xe   :  { %57 = vperm.xlu1 %122, %v18_v7   ;;  %52 = vperm.xlu0 %121, %v17_v8  }
  0x7d   :  { %v33_v10 = vpop.permute.xlu1 %32  ;;  %v23_v11 = vpop.permute.xlu0 %22 }
  0x7e   :  { %v68_v12 = vsub.f32 %v33_v10, %v119_v9  ;;  %v66_v13 = vsub.f32 %v23_v11, %v119_v9 }
  0x80   :  { %v76_v14 = vmul.f32 %v68_v12, %v68_v12  ;;  %v74_v15 = vmul.f32 %v66_v13, %v66_v13 }
  0x81   :  { %v38_v16 = vpop.permute.xlu1 %37  ;;  %v28_v17 = vpop.permute.xlu0 %27 }
  0x82   :  { %v84_v18 = vmul.f32 -48.019997, %v76_v14  ;;  %v82_v19 = vmul.f32 -48.019997, %v74_v15  ;;  %v69_v20 = vsub.f32 %v38_v16, %v119_v9  ;;  %v67_v21 = vsub.f32 %v28_v17, %v119_v9 }
  0x84   :  { %v94_v22 = vmul.f32 1.442695, %v84_v18  ;;  %v90_v23 = vmul.f32 1.442695, %v82_v19  ;;  %v77_v24 = vmul.f32 %v69_v20, %v69_v20  ;;  %v75_v25 = vmul.f32 %v67_v21, %v67_v21 }
  0x85   :  { %v48_v26 = vpop.permute.xlu1 %47  ;;  %v43_v27 = vpop.permute.xlu0 %42 }
  0x86   :  { %123 = vpow2.f32 %v94_v22  ;;  %v85_v28 = vmul.f32 -48.019997, %v77_v24  ;;  %v83_v29 = vmul.f32 -48.019997, %v75_v25  ;;  %v71_v30 = vsub.f32 %v48_v26, %v119_v9 }
  0x87   :  { %125 = vpow2.f32 %v90_v23  ;;  %v70_v31 = vsub.f32 %v43_v27, %v119_v9 }
  0x88   :  { %v96_v32 = vmul.f32 1.442695, %v85_v28  ;;  %v92_v33 = vmul.f32 1.442695, %v83_v29  ;;  %v79_v34 = vmul.f32 %v71_v30, %v71_v30 }
  0x89   :  { %v78_v35 = vmul.f32 %v70_v31, %v70_v31  ;;  %v58_v36 = vpop.permute.xlu1 %57  ;;  %v53_v37 = vpop.permute.xlu0 %52 }
  0x8a   :  { %127 = vpow2.f32 %v96_v32  ;;  %v87_v38 = vmul.f32 -48.019997, %v79_v34  ;;  %v73_v39 = vsub.f32 %v58_v36, %v119_v9  ;;  %v72_v40 = vsub.f32 %v53_v37, %v119_v9 }
  0x8b   :  { %129 = vpow2.f32 %v92_v33  ;;  %v86_v41 = vmul.f32 -48.019997, %v78_v35 }
  0x8c   :  { %v100_v42 = vmul.f32 1.442695, %v87_v38  ;;  %v81_v43 = vmul.f32 %v73_v39, %v73_v39  ;;  %v80_v44 = vmul.f32 %v72_v40, %v72_v40 }
  0x8d   :  { %v98_v45 = vmul.f32 1.442695, %v86_v41 }
  0x8e   :  { %131 = vpow2.f32 %v100_v42  ;;  %v89_v46 = vmul.f32 -48.019997, %v81_v43  ;;  %v88_v47 = vmul.f32 -48.019997, %v80_v44 }
  0x8f   :  { %133 = vpow2.f32 %v98_v45 }
  0x90   :  { %v104_v48 = vmul.f32 1.442695, %v89_v46  ;;  %v102_v49 = vmul.f32 1.442695, %v88_v47 }
  0x92   :  { %135 = vpow2.f32 %v104_v48 }
  0x93   :  { %v124_v50 = vpop.eup %123  ;;  %137 = vpow2.f32 %v102_v49 }
  0x94   :  { %v126_v51 = vpop.eup %125  ;;  %109 = vst.msk [vmem:[%s216_s2 + $0x10] sm:$0xff] %vm106_vm0, %v124_v50 }
  0x95   :  { %107 = vst.msk [vmem:[%s216_s2] sm:$0xff] %vm106_vm0, %v126_v51 }
  0x97   :  { %v128_v52 = vpop.eup %127 }
  0x98   :  { %v130_v53 = vpop.eup %129  ;;  %110 = vst.msk [vmem:[%s216_s2 + $0x18] sm:$0xff] %vm106_vm0, %v128_v52 }
  0x99   :  { %108 = vst.msk [vmem:[%s216_s2 + $0x8] sm:$0xff] %vm106_vm0, %v130_v53 }
  0x9b   :  { %v132_v54 = vpop.eup %131 }
  0x9c   :  { %v134_v55 = vpop.eup %133  ;;  %112 = vst.msk [vmem:[%s216_s2 + $0x28] sm:$0xff] %vm106_vm0, %v132_v54 }
  0x9d   :  { %111 = vst.msk [vmem:[%s216_s2 + $0x20] sm:$0xff] %vm106_vm0, %v134_v55 }
  0x9f   :  { %v136_v56 = vpop.eup %135 }
  0xa0   :  { %v138_v57 = vpop.eup %137  ;;  %114 = vst.msk [vmem:[%s216_s2 + $0x38] sm:$0xff] %vm106_vm0, %v136_v56 }
  0xa1   :  { %113 = vst.msk [vmem:[%s216_s2 + $0x30] sm:$0xff] %vm106_vm0, %v138_v57 }

</bundles_post_ra>
